<compile_context>
chip_gen: v5e
topology: v5e:2x2
jax: 0.10.0
libtpu: 0.0.40
codegen_flags: <defaults>
</compile_context>

<pallas_src>
import functools

import jax
import jax.numpy as jnp
from jax import lax
from jax.experimental import pallas as pl
from jax.experimental.pallas import tpu as pltpu


def _round_up(x: int, m: int) -> int:
    return ((x + m - 1) // m) * m


# ---------------------------------------------------------------------------
# Kernels
# ---------------------------------------------------------------------------
def _rinv_kernel(*refs, symmetric: bool):
    """Phase 1: r_inv = rsqrt(rowsum(A_sym) + 1), reduced over column tiles."""
    if symmetric:
        a_ref, at_ref, out_ref = refs
    else:
        a_ref, out_ref = refs
    j = pl.program_id(1)

    a = a_ref[...]
    if symmetric:
        # per-tile transpose only; the transposed tile arrives via its own DMA
        # (swapped index_map), XLU slot is otherwise idle in this mem-bound kernel
        a = 0.5 * (a + at_ref[...].T)
    partial = jnp.sum(a, axis=1, keepdims=True)          # (T, 1)

    @pl.when(j == 0)
    def _():
        out_ref[...] = jnp.zeros_like(out_ref)

    out_ref[...] += partial

    @pl.when(j == pl.num_programs(1) - 1)
    def _():
        # +I contributes exactly 1 per row -> never materialize eye here.
        rowsum = out_ref[...] + 1.0
        # rsqrt on EUP; rowsum==0 -> 0 (matches torch's isinf guard),
        # rowsum<0 -> NaN (matches torch pow(-1/2) semantics).
        out_ref[...] = jnp.where(rowsum == 0.0, 0.0, lax.rsqrt(rowsum))


def _scale_kernel(*refs, symmetric: bool):
    """Phase 2: out[i,j] = r_inv[i] * (A_sym[i,j] + I[i,j]) * r_inv[j]."""
    if symmetric:
        rcol_ref, rrow_ref, a_ref, at_ref, out_ref = refs
    else:
        rcol_ref, rrow_ref, a_ref, out_ref = refs
    i = pl.program_id(0)
    j = pl.program_id(1)

    a = a_ref[...]
    if symmetric:
        a = 0.5 * (a + at_ref[...].T)

    rc = rcol_ref[...]            # (T, 1) -- column orientation, precomputed
    rr = rrow_ref[...]            # (1, T) -- row orientation, precomputed
    scaled = (rc * a) * rr

    @pl.when(i == j)
    def _():
        # Identity only on diagonal tiles; scaled identity = r_inv[k]^2 on diag.
        rid = lax.broadcasted_iota(jnp.int32, a.shape, 0)
        cid = lax.broadcasted_iota(jnp.int32, a.shape, 1)
        eye = (rid == cid).astype(a.dtype)
        out_ref[...] = scaled + eye * rc * rr

    @pl.when(i != j)
    def _():
        out_ref[...] = scaled


# ---------------------------------------------------------------------------
# Module-like wrapper
# ---------------------------------------------------------------------------
class EstimateAdjPallas:
    """JAX/Pallas equivalent of hype.defence.EstimateAdj."""

    def __init__(self, adj: jax.Array, symmetric: bool = False, tile: int = 512):
        n = adj.shape[0]
        assert adj.shape == (n, n)
        self.estimated_adj = jnp.asarray(adj, dtype=jnp.float32)
        self.symmetric = symmetric
        self.n = n

        # Lane-dense, (8,128)-aligned square tiles; pad n up to a multiple.
        t = min(_round_up(int(tile), 128), _round_up(n, 128))
        N = _round_up(n, t)
        self.tile = t
        self.n_pad = N
        nt = N // t

        # ------------- phase 1: rowsum -> r_inv --------------------------
        in_specs1 = [pl.BlockSpec((t, t), lambda i, j: (i, j))]
        if symmetric:
            in_specs1.append(pl.BlockSpec((t, t), lambda i, j: (j, i)))
        self._rinv_call = pl.pallas_call(
            functools.partial(_rinv_kernel, symmetric=symmetric),
            out_shape=jax.ShapeDtypeStruct((N, 1), jnp.float32),
            grid=(nt, nt),
            in_specs=in_specs1,
            # same block index across j -> resident accumulator
            out_specs=pl.BlockSpec((t, 1), lambda i, j: (i, 0)),
            compiler_params=pltpu.CompilerParams(
                dimension_semantics=("parallel", "arbitrary")),
        )

        # ------------- phase 2: block-wise scaling ------------------------
        in_specs2 = [
            pl.BlockSpec((t, 1), lambda i, j: (i, 0)),   # r_inv column chunk
            pl.BlockSpec((1, t), lambda i, j: (0, j)),   # r_inv row chunk
            pl.BlockSpec((t, t), lambda i, j: (i, j)),   # A block
        ]
        if symmetric:
            in_specs2.append(pl.BlockSpec((t, t), lambda i, j: (j, i)))  # A^T block via DMA
        self._scale_call = pl.pallas_call(
            functools.partial(_scale_kernel, symmetric=symmetric),
            out_shape=jax.ShapeDtypeStruct((N, N), jnp.float32),
            grid=(nt, nt),
            in_specs=in_specs2,
            out_specs=pl.BlockSpec((t, t), lambda i, j: (i, j)),
            compiler_params=pltpu.CompilerParams(
                dimension_semantics=("parallel", "parallel")),
        )

    def forward(self) -> jax.Array:
        # PyTorch forward() just returns the parameter; no copy kernel needed.
        return self.estimated_adj

    def normalize(self) -> jax.Array:
        n, N = self.n, self.n_pad
        a = self.estimated_adj
        if N != n:
            a = jnp.pad(a, ((0, N - n), (0, N - n)))   # zero-pad; sliced away below
        args = (a, a) if self.symmetric else (a,)
        r_col = self._rinv_call(*args)                 # (N, 1)
        r_row = jnp.reshape(r_col, (1, N))             # tiny one-time layout op
        out = self._scale_call(r_col, r_row, *args)
        return out[:n, :n] if N != n else out


# ---------------------------------------------------------------------------
# Pure-JAX reference (sanity check)
# ---------------------------------------------------------------------------
def _normalize_ref(adj, symmetric):
    a = (adj + adj.T) / 2 if symmetric else adj
    n = a.shape[0]
    mx = a + jnp.eye(n, dtype=a.dtype)
    rowsum = mx.sum(1)
    r_inv = rowsum ** (-0.5)
    r_inv = jnp.where(jnp.isinf(r_inv), 0.0, r_inv)
    return r_inv[:, None] * mx * r_inv[None, :]


if __name__ == "__main__":
    n = 300  # non-128-aligned on purpose (exercises padding; pads to 384)

    key = jax.random.PRNGKey(0)
    raw = jax.random.uniform(key, (n, n), dtype=jnp.float32)
    adj = (raw > 0.9).astype(jnp.float32)

    # Multi-tile path (3x3 grid of 128-wide tiles after padding).
    model = EstimateAdjPallas(adj, symmetric=False, tile=128)

    fwd = jax.block_until_ready(model.forward())
    assert fwd.shape == (n, n) and fwd.dtype == jnp.float32
    assert bool(jnp.allclose(fwd, adj))

    norm = jax.block_until_ready(model.normalize())
    ref = _normalize_ref(model.estimated_adj, False)
    assert bool(jnp.allclose(norm, ref, atol=1e-5, rtol=1e-4))

    # Symmetric branch (transposed tiles fetched via swapped index_maps).
    model_sym = EstimateAdjPallas(adj, symmetric=True, tile=128)
    norm_sym = jax.block_until_ready(model_sym.normalize())
    ref_sym = _normalize_ref(model_sym.estimated_adj, True)
    assert bool(jnp.allclose(norm_sym, ref_sym, atol=1e-5, rtol=1e-4))

    # Single big-tile path (default tile >= padded n).
    model_big = EstimateAdjPallas(adj, symmetric=False)
    norm_big = jax.block_until_ready(model_big.normalize())
    assert bool(jnp.allclose(norm_big, ref, atol=1e-5, rtol=1e-4))

    print("KERNEL_OK")
</pallas_src>

<mosaic_0001>
module attributes {stable_mosaic.version = 11 : i64} {
  func.func @_rinv_kernel(%arg0: i32, %arg1: i32, %arg2: memref<128x128xf32, #tpu.memory_space<vmem>>, %arg3: memref<128x1xf32, #tpu.memory_space<vmem>>) attributes {dimension_semantics = [#tpu.dimension_semantics<parallel>, #tpu.dimension_semantics<arbitrary>], iteration_bounds = array<i64: 3, 3>, scalar_prefetch = 0 : i64, scratch_operands = 0 : i64, tpu.core_type = #tpu.core_type<tc>, window_params = [{transform_indices = @transform_0, window_bounds = array<i64: 128, 128>}, {transform_indices = @transform_1, window_bounds = array<i64: 128, 1>}]} {
    %c0 = arith.constant 0 : index
    %c0_0 = arith.constant 0 : index
    %0 = vector.load %arg2[%c0, %c0_0] : memref<128x128xf32, #tpu.memory_space<vmem>>, vector<128x128xf32>
    %cst = arith.constant dense<0.000000e+00> : vector<128xf32>
    %1 = vector.multi_reduction <add>, %0, %cst [1] : vector<128x128xf32> to vector<128xf32>
    %2 = vector.shape_cast %1 : vector<128xf32> to vector<128x1xf32>
    %c0_i32 = arith.constant 0 : i32
    %3 = arith.cmpi eq, %arg1, %c0_i32 : i32
    %4 = arith.extui %3 : i1 to i32
    %c0_i32_1 = arith.constant 0 : i32
    %5 = arith.cmpi ne, %4, %c0_i32_1 : i32
    scf.if %5 {
      %cst_7 = arith.constant 0.000000e+00 : f32
      %12 = vector.broadcast %cst_7 : f32 to vector<128x1xf32>
      %c0_8 = arith.constant 0 : index
      %c0_9 = arith.constant 0 : index
      %13 = vector.load %arg3[%c0_8, %c0_9] : memref<128x1xf32, #tpu.memory_space<vmem>>, vector<128x1xf32>
      tpu.vector_store %arg3[%c0_8, %c0_9], %12 {strides = array<i32>} : memref<128x1xf32, #tpu.memory_space<vmem>>, vector<128x1xf32>,
    } else {
    }
    %c0_2 = arith.constant 0 : index
    %c0_3 = arith.constant 0 : index
    %6 = vector.load %arg3[%c0_2, %c0_3] : memref<128x1xf32, #tpu.memory_space<vmem>>, vector<128x1xf32>
    %7 = arith.addf %6, %2 : vector<128x1xf32>
    %c0_4 = arith.constant 0 : index
    %c0_5 = arith.constant 0 : index
    %8 = vector.load %arg3[%c0_4, %c0_5] : memref<128x1xf32, #tpu.memory_space<vmem>>, vector<128x1xf32>
    tpu.vector_store %arg3[%c0_4, %c0_5], %7 {strides = array<i32>} : memref<128x1xf32, #tpu.memory_space<vmem>>, vector<128x1xf32>,
    %c2_i32 = arith.constant 2 : i32
    %9 = arith.cmpi eq, %arg1, %c2_i32 : i32
    %10 = arith.extui %9 : i1 to i32
    %c0_i32_6 = arith.constant 0 : i32
    %11 = arith.cmpi ne, %10, %c0_i32_6 : i32
    scf.if %11 {
      %c0_7 = arith.constant 0 : index
      %c0_8 = arith.constant 0 : index
      %12 = vector.load %arg3[%c0_7, %c0_8] : memref<128x1xf32, #tpu.memory_space<vmem>>, vector<128x1xf32>
      %cst_9 = arith.constant 1.000000e+00 : f32
      %13 = vector.broadcast %cst_9 : f32 to vector<128x1xf32>
      %14 = arith.addf %12, %13 : vector<128x1xf32>
      %cst_10 = arith.constant 0.000000e+00 : f32
      %15 = vector.broadcast %cst_10 : f32 to vector<128x1xf32>
      %16 = arith.cmpf oeq, %14, %15 : vector<128x1xf32>
      %17 = math.rsqrt %14 : vector<128x1xf32>
      %cst_11 = arith.constant 0.000000e+00 : f32
      %18 = vector.broadcast %cst_11 : f32 to vector<128x1xf32>
      %19 = arith.select %16, %18, %17 : vector<128x1xi1>, vector<128x1xf32>
      %c0_12 = arith.constant 0 : index
      %c0_13 = arith.constant 0 : index
      %20 = vector.load %arg3[%c0_12, %c0_13] : memref<128x1xf32, #tpu.memory_space<vmem>>, vector<128x1xf32>
      tpu.vector_store %arg3[%c0_12, %c0_13], %19 {strides = array<i32>} : memref<128x1xf32, #tpu.memory_space<vmem>>, vector<128x1xf32>,
    } else {
    }
    return
  }
  func.func @transform_0(%arg0: i32, %arg1: i32) -> (i32, i32) {
    %c0_i32 = arith.constant 0 : i32
    return %arg0, %arg1 : i32, i32
  }
  func.func @transform_1(%arg0: i32, %arg1: i32) -> (i32, i32) {
    %c0_i32 = arith.constant 0 : i32
    %c0_i32_0 = arith.constant 0 : i32
    return %arg0, %c0_i32 : i32, i32
  }
}

</mosaic_0001>

<bundles_post_ra>
// kernel: tpu_custom_call.1
= control target key start
LH: loop header
LB: loop body
LE: loop exit
PB: predicated region body
PF: predicated region fallthrough
CT: control target
= control target key end

     0   :  { %6 = vsyncpa [#allocation3], 0  ;;  %s1413_s0 = inlined_call_operand.hbm [shape: f32[384,384], index: 0, kind: input, shape index: {}]   ;;  %s1414_s1 = inlined_call_operand.vmem [shape: f32[384,1], index: 1, kind: output, shape index: {}]  }
   0x1   :  { %8 = vsyncpa [#allocation3 + $0x1], 0  ;;  %s836_s6 = smov 0   ;;  %s838_s7 = smov 0  }
   0x2   :  { %s840_s8 = smov 0   ;;  %s842_s9 = smov 0  }
   0x3   :  { %s844_s10 = smov 0   ;;  %s846_s11 = smov 0  }
   0x4   :  { %s848_s12 = smov 0   ;;  %s850_s13 = smov 0  }
   0x5 LB: > { %s600_s14 = sadd.s32 4294967295, %s820_s13   ;;  %s23_s15 = sadd.s32 1, %s812_s11  ;;  %s820_s13 = sphi %s850_s13, %s14_s13   ;;  %s816_s12 = sphi %s848_s12, %s1457_s12   ;;  %s812_s11 = sphi %s846_s11, %s1456_s11   ;;  %s808_s10 = sphi %s844_s10, %s1455_s10   ;;  %s804_s9 = sphi %s842_s9, %s1454_s9   ;;  %s800_s8 = sphi %s840_s8, %s1453_s8   ;;  %s796_s7 = sphi %s838_s7, %s1452_s7   ;;  %s792_s6 = sphi %s836_s6, %s1451_s6  }
   0x6   : > { %p24_p0 = scmp.ge.s32.totalorder %s23_s15, 3  ;;  %s26_s16 = sadd.s32 1, %s816_s12 }
   0x7   : > { %s35_s17 = sadd.s32 1, %s800_s8  ;;  %p42_p1 = scmp.ne.s32.totalorder %s800_s8, %s796_s7 }
   0x8   : > { %s1459_s15 = smov (%p24_p0, %s23_s15), 0  ;;  %s1461_s16 = smov (!%p24_p0, %s26_s16), %s816_s12 }
   0x9   : > { %s31_s18 = ssub.s32 %s812_s11, %s1459_s15  ;;  %p43_p2 = scmp.eq.s32.totalorder %s820_s13, 0 }
   0xa   : > { %p28_p3 = scmp.ge.s32.totalorder %s1461_s16, 3  ;;  %p48_p4 = scmp.ne.s32.totalorder %s796_s7, %s792_s6 }
   0xb   : > { %p887_p5 = por %p43_p2, %p42_p1  ;;  %p49_p6 = scmp.eq.s32.totalorder %s600_s14, 0 }
   0xc   : > { %s1463_s16 = smov (%p28_p3, %s1461_s16), 0  ;;  %p623_p8 = scmp.lt.s32.totalorder %s820_s13, 9 }
   0xd   : > { %p893_p7 = por %p49_p6, %p48_p4  ;;  %s30_s21 = ssub.s32 %s816_s12, %s1463_s16 }
   0xe   : > { %s32_s22 = sor.u32 %s31_s18, %s30_s21  ;;  %s98_s23 = sand.u32 1, %s800_s8  }
   0xf   : > { %p33_p9 = scmp.eq.s32.totalorder %s32_s22, 0  ;;  %s604_s24 = sshll.u32 %s98_s23, 7 }
  0x10   : > { %s616_s25 = smul.u32 48, %s816_s12  ;;  %s102_s29 = scalar_lea.vmem [#allocation2], %s604_s24 }
  0x11   : > { %s903_s26 = scalar_select %p33_p9, %s800_s8, %s35_s17  }
  0x12   : > { %s107_s27 = sadd.s32 %s812_s11, %s616_s25  ;;  %s112_s30 = sshll.u32 %s102_s29, 4  ;;  %s113_s30 = int_to_ptr.vmem [resolvable:$true] %s112_s30 }
  0x13   : > { %s607_s28 = sshll.u32 %s107_s27, 3  ;;  %p620_p10 = pnand %p623_p8, %p887_p5 }
  0x14   : > { %s109_s4 = scalar_lea.hbm %s1413_s0, %s607_s28  ;;  %p608_p11 = scmp.ge.s32.totalorder %s820_s13, 1 }
  0x15   : > { %s110_s5 = sshll.u32 %s109_s4, 4  ;;  %s99_s6 = scalar_lea.sflag [#allocation3], %s98_s23  ;;  %s111_s5 = int_to_ptr.hbm [resolvable:$true] %s110_s5 }
  0x16   : > { %s822_s14 = smov 384   ;;  %s823_s17 = smov 128  }
  0x17   : > { %s824_s18 = smov 8   ;;  %p120_p12 = scmp.lt.s32.totalorder %s820_s13, 10 }
  0x18   : > { %622 = dma.hbm_to_vmem [thread:$0]  (!%p620_p10), %s111_s5, 2048, %s113_s30, %s99_s6, %s822_s14, %s823_s17, %s824_s18  }
  0x19   : > { %p121_p13 = pnand %p608_p11, %p120_p12 }
  0x1a   : > { %s126_s21 = sand.u32 (!%p121_p13), 1, %s796_s7  }
  0x1b   : > { %124 = sbr.rel (%p121_p13) target bundleno = 281 (0x119), region = 24  ;;  %s609_s22 = sshll.u32 (!%p121_p13), %s126_s21, 7 }
  0x1c   : > { %s127_s24 = scalar_lea.sflag (!%p121_p13), [#allocation3], %s126_s21  ;;  %s916_s25 = scalar_lea.vmem (!%p121_p13), [#allocation2], %s609_s22 }
  0x20   : > { %787 = dma.done.wait (%p893_p7), %s127_s24, 2048  }
  0x21   : > { %789 = vsyncadd (%p893_p7), %s127_s24, 4294965248  ;;  %v157_v0 = vld [vmem:[%s916_s25] sm:$0xff]  ;;  %v159_v2 = vld [vmem:[%s916_s25 + $0x10] sm:$0xff]  ;;  %s610_s19 = sshll.u32 %s808_s10, 4  ;;  %p612_p1 = scmp.ne.s32.totalorder %s804_s9, 0 }
  0x22   : > { %v161_v1 = vld [vmem:[%s916_s25 + $0x20] sm:$0xff]  ;;  %173 = vadd.xlane.f32.xlu0 %v157_v0  ;;  %177 = vadd.xlane.f32.xlu1 %v159_v2  ;;  %v158_v3 = vld [vmem:[%s916_s25 + $0x8] sm:$0xff]  ;;  %v160_v5 = vld [vmem:[%s916_s25 + $0x18] sm:$0xff]  ;;  %p152_p0 = scmp.lt.s32.totalorder %s610_s19, 47 }
  0x23   : > { %181 = vadd.xlane.f32.xlu2 %v161_v1  ;;  %v162_v4 = vld [vmem:[%s916_s25 + $0x28] sm:$0xff]  ;;  %v163_v6 = vld [vmem:[%s916_s25 + $0x30] sm:$0xff]  ;;  %v165_v7 = vld [vmem:[%s916_s25 + $0x40] sm:$0xff] }
  0x24   : > { %v164_v8 = vld [vmem:[%s916_s25 + $0x38] sm:$0xff]  ;;  %v166_v9 = vld [vmem:[%s916_s25 + $0x48] sm:$0xff]  ;;  %v167_v11 = vld [vmem:[%s916_s25 + $0x50] sm:$0xff]  ;;  %s1465_s19 = smov (!%p152_p0, %s610_s19), 47 }
  0x25   : > { %v168_v10 = vld [vmem:[%s916_s25 + $0x58] sm:$0xff]  ;;  %s611_s20 = sshll.u32 %s1465_s19, 3  ;;  %v169_v12 = vld [vmem:[%s916_s25 + $0x60] sm:$0xff]  ;;  %v171_v13 = vld [vmem:[%s916_s25 + $0x70] sm:$0xff] }
  0x26   : > { %s938_s28 = scalar_lea.vmem %s1414_s1, %s611_s20  ;;  %v170_v14 = vld [vmem:[%s916_s25 + $0x68] sm:$0xff]  ;;  %v172_v15 = vld [vmem:[%s916_s25 + $0x78] sm:$0xff] }
  0x2a   : > { %175 = vadd.xlane.f32.xlu0 %v158_v3  ;;  %179 = vadd.xlane.f32.xlu1 %v160_v5 }
  0x2b   : > { %183 = vadd.xlane.f32.xlu2 %v162_v4 }
  0x32   : > { %185 = vadd.xlane.f32.xlu0 %v163_v6  ;;  %187 = vadd.xlane.f32.xlu1 %v164_v8 }
  0x33   : > { %189 = vadd.xlane.f32.xlu2 %v165_v7 }
  0x3a   : > { %191 = vadd.xlane.f32.xlu0 %v166_v9  ;;  %193 = vadd.xlane.f32.xlu1 %v167_v11 }
  0x3b   : > { %195 = vadd.xlane.f32.xlu2 %v168_v10 }
  0x42   : > { %197 = vadd.xlane.f32.xlu0 %v169_v12  ;;  %199 = vadd.xlane.f32.xlu1 %v170_v14 }
  0x43   : > { %201 = vadd.xlane.f32.xlu2 %v171_v13 }
  0x4a   : > { %203 = vadd.xlane.f32.xlu0 %v172_v15 }
  0x95   : > { %v174_v16 = vpop.xlane.xlu0 %173  ;;  %v178_v18 = vpop.xlane.xlu1 %177 }
  0x96   : > { %v182_v17 = vpop.xlane.xlu2 %181 }
  0x9d   : > { %v176_v19 = vpop.xlane.xlu0 %175  ;;  %v180_v21 = vpop.xlane.xlu1 %179 }
  0x9e   : > { %v184_v20 = vpop.xlane.xlu2 %183 }
  0xa5   : > { %v186_v22 = vpop.xlane.xlu0 %185  ;;  %v188_v24 = vpop.xlane.xlu1 %187 }
  0xa6   : > { %v190_v23 = vpop.xlane.xlu2 %189 }
  0xad   : > { %v192_v25 = vpop.xlane.xlu0 %191  ;;  %v194_v27 = vpop.xlane.xlu1 %193 }
  0xae   : > { %v196_v26 = vpop.xlane.xlu2 %195 }
  0xb5   : > { %v198_v28 = vpop.xlane.xlu0 %197  ;;  %v946_v30 = vpop.xlane.xlu1 %199 }
  0xb6   : > { %v944_v29 = vpop.xlane.xlu2 %201 }
  0xb9   : > { %208 = sbr.rel (%p612_p1) target bundleno = 207 (0xcf), region = 32 }
  0xbd   : > { %v948_v31 = vpop.xlane.xlu0 %203 }
  0xbe   : > { %vm209_vm0 = vcmask 7168   ;;  %v825_v32 = vmov 0.0  }
  0xbf   : > { %210 = vst.msk [vmem:[%s938_s28] sm:$0xff] %vm209_vm0, %v825_v32 }
  0xc0   : > { %211 = vst.msk [vmem:[%s938_s28 + $0x8] sm:$0xff] %vm209_vm0, %v825_v32 }
  0xc1   : > { %212 = vst.msk [vmem:[%s938_s28 + $0x10] sm:$0xff] %vm209_vm0, %v825_v32 }
  0xc2   : > { %213 = vst.msk [vmem:[%s938_s28 + $0x18] sm:$0xff] %vm209_vm0, %v825_v32 }
  0xc3   : > { %214 = vst.msk [vmem:[%s938_s28 + $0x20] sm:$0xff] %vm209_vm0, %v825_v32 }
  0xc4   : > { %215 = vst.msk [vmem:[%s938_s28 + $0x28] sm:$0xff] %vm209_vm0, %v825_v32 }
  0xc5   : > { %216 = vst.msk [vmem:[%s938_s28 + $0x30] sm:$0xff] %vm209_vm0, %v825_v32 }
  0xc6   : > { %217 = vst.msk [vmem:[%s938_s28 + $0x38] sm:$0xff] %vm209_vm0, %v825_v32 }
  0xc7   : > { %218 = vst.msk [vmem:[%s938_s28 + $0x40] sm:$0xff] %vm209_vm0, %v825_v32 }
  0xc8   : > { %219 = vst.msk [vmem:[%s938_s28 + $0x48] sm:$0xff] %vm209_vm0, %v825_v32 }
  0xc9   : > { %220 = vst.msk [vmem:[%s938_s28 + $0x50] sm:$0xff] %vm209_vm0, %v825_v32 }
  0xca   : > { %221 = vst.msk [vmem:[%s938_s28 + $0x58] sm:$0xff] %vm209_vm0, %v825_v32 }
  0xcb   : > { %222 = vst.msk [vmem:[%s938_s28 + $0x60] sm:$0xff] %vm209_vm0, %v825_v32 }
  0xcc   : > { %223 = vst.msk [vmem:[%s938_s28 + $0x68] sm:$0xff] %vm209_vm0, %v825_v32 }
  0xcd   : > { %224 = vst.msk [vmem:[%s938_s28 + $0x70] sm:$0xff] %vm209_vm0, %v825_v32 }
  0xce   : > { %225 = vst.msk [vmem:[%s938_s28 + $0x78] sm:$0xff] %vm209_vm0, %v825_v32 }
  0xcf PF: > { %v226_v33 = vld [vmem:[%s938_s28] sm:$0xff]  ;;  %vm258_vm1 = vcmask 7168   ;;  %v227_v34 = vld [vmem:[%s938_s28 + $0x8] sm:$0xff]  ;;  %v228_v35 = vld [vmem:[%s938_s28 + $0x10] sm:$0xff]  ;;  %p613_p2 = scmp.ne.s32.totalorder %s804_s9, 2 }
  0xd0   : > { %v242_v36 = vadd.f32 %v226_v33, %v174_v16  ;;  %v243_v37 = vadd.f32 %v227_v34, %v176_v19  ;;  %v244_v38 = vadd.f32 %v228_v35, %v178_v18  ;;  %v229_v39 = vld [vmem:[%s938_s28 + $0x18] sm:$0xff]  ;;  %v230_v40 = vld [vmem:[%s938_s28 + $0x20] sm:$0xff]  ;;  %v231_v41 = vld [vmem:[%s938_s28 + $0x28] sm:$0xff] }
  0xd1   : > { %v245_v42 = vadd.f32 %v229_v39, %v180_v21  ;;  %v232_v43 = vld [vmem:[%s938_s28 + $0x30] sm:$0xff]  ;;  %v246_v44 = vadd.f32 %v230_v40, %v182_v17  ;;  %v233_v45 = vld [vmem:[%s938_s28 + $0x38] sm:$0xff]  ;;  %v247_v46 = vadd.f32 %v231_v41, %v184_v20  ;;  %v234_v47 = vld [vmem:[%s938_s28 + $0x40] sm:$0xff] }
  0xd2   : > { %259 = vst.msk [vmem:[%s938_s28] sm:$0xff] %vm258_vm1, %v242_v36  ;;  %v248_v48 = vadd.f32 %v232_v43, %v186_v22  ;;  %v235_v49 = vld [vmem:[%s938_s28 + $0x48] sm:$0xff]  ;;  %v249_v50 = vadd.f32 %v233_v45, %v188_v24  ;;  %v236_v51 = vld [vmem:[%s938_s28 + $0x50] sm:$0xff]  ;;  %v250_v52 = vadd.f32 %v234_v47, %v190_v23  ;;  %v237_v53 = vld [vmem:[%s938_s28 + $0x58] sm:$0xff] }
  0xd3   : > { %260 = vst.msk [vmem:[%s938_s28 + $0x8] sm:$0xff] %vm258_vm1, %v243_v37  ;;  %v251_v54 = vadd.f32 %v235_v49, %v192_v25  ;;  %v238_v55 = vld [vmem:[%s938_s28 + $0x60] sm:$0xff]  ;;  %v252_v56 = vadd.f32 %v236_v51, %v194_v27  ;;  %v239_v57 = vld [vmem:[%s938_s28 + $0x68] sm:$0xff]  ;;  %v253_v58 = vadd.f32 %v237_v53, %v196_v26 }
  0xd4   : > { %261 = vst.msk [vmem:[%s938_s28 + $0x10] sm:$0xff] %vm258_vm1, %v244_v38  ;;  %v240_v59 = vld [vmem:[%s938_s28 + $0x70] sm:$0xff]  ;;  %v254_v60 = vadd.f32 %v238_v55, %v198_v28  ;;  %v255_v62 = vadd.f32 %v239_v57, %v946_v30 }
  0xd5   : > { %262 = vst.msk [vmem:[%s938_s28 + $0x18] sm:$0xff] %vm258_vm1, %v245_v42  ;;  %v241_v61 = vld [vmem:[%s938_s28 + $0x78] sm:$0xff]  ;;  %v256_v63 = vadd.f32 %v240_v59, %v944_v29 }
  0xd6   : > { %263 = vst.msk [vmem:[%s938_s28 + $0x20] sm:$0xff] %vm258_vm1, %v246_v44  ;;  %v257_v0 = vadd.f32 %v241_v61, %v948_v31 }
  0xd7   : > { %264 = vst.msk [vmem:[%s938_s28 + $0x28] sm:$0xff] %vm258_vm1, %v247_v46 }
  0xd8   : > { %265 = vst.msk [vmem:[%s938_s28 + $0x30] sm:$0xff] %vm258_vm1, %v248_v48 }
  0xd9   : > { %266 = vst.msk [vmem:[%s938_s28 + $0x38] sm:$0xff] %vm258_vm1, %v249_v50 }
  0xda   : > { %267 = vst.msk [vmem:[%s938_s28 + $0x40] sm:$0xff] %vm258_vm1, %v250_v52 }
  0xdb   : > { %268 = vst.msk [vmem:[%s938_s28 + $0x48] sm:$0xff] %vm258_vm1, %v251_v54 }
  0xdc   : > { %269 = vst.msk [vmem:[%s938_s28 + $0x50] sm:$0xff] %vm258_vm1, %v252_v56 }
  0xdd   : > { %270 = vst.msk [vmem:[%s938_s28 + $0x58] sm:$0xff] %vm258_vm1, %v253_v58  ;;  %278 = sbr.rel (%p613_p2) target bundleno = 281 (0x119), region = 36 }
  0xde   : > { %271 = vst.msk [vmem:[%s938_s28 + $0x60] sm:$0xff] %vm258_vm1, %v254_v60 }
  0xdf   : > { %272 = vst.msk [vmem:[%s938_s28 + $0x68] sm:$0xff] %vm258_vm1, %v255_v62 }
  0xe0   : > { %273 = vst.msk [vmem:[%s938_s28 + $0x70] sm:$0xff] %vm258_vm1, %v256_v63 }
  0xe1   : > { %274 = vst.msk [vmem:[%s938_s28 + $0x78] sm:$0xff] %vm258_vm1, %v257_v0 }
  0xe2   : > { %v279_v1 = vld [vmem:[%s938_s28] sm:$0xff]  ;;  %v280_v2 = vld [vmem:[%s938_s28 + $0x8] sm:$0xff]  ;;  %v281_v3 = vld [vmem:[%s938_s28 + $0x10] sm:$0xff] }
  0xe3   : > { %v1038_v4 = vadd.f32 1.0, %v279_v1  ;;  %v1040_v5 = vadd.f32 1.0, %v280_v2  ;;  %v1042_v6 = vadd.f32 1.0, %v281_v3  ;;  %v282_v7 = vld [vmem:[%s938_s28 + $0x18] sm:$0xff]  ;;  %v283_v8 = vld [vmem:[%s938_s28 + $0x20] sm:$0xff]  ;;  %v284_v9 = vld [vmem:[%s938_s28 + $0x28] sm:$0xff] }
  0xe4   : > { %v1047_v10 = vadd.f32 1.0, %v282_v7  ;;  %v1050_v11 = vadd.f32 1.0, %v283_v8  ;;  %v1053_v12 = vadd.f32 1.0, %v284_v9  ;;  %v285_v13 = vld [vmem:[%s938_s28 + $0x30] sm:$0xff]  ;;  %v286_v14 = vld [vmem:[%s938_s28 + $0x38] sm:$0xff]  ;;  %v287_v15 = vld [vmem:[%s938_s28 + $0x40] sm:$0xff] }
  0xe5   : > { %692 = vrsqrt.f32 %v1038_v4  ;;  %v1061_v16 = vadd.f32 1.0, %v285_v13  ;;  %v1063_v17 = vadd.f32 1.0, %v286_v14  ;;  %v288_v18 = vld [vmem:[%s938_s28 + $0x48] sm:$0xff]  ;;  %vm333_vm2 = vweird.f32 %v1038_v4  ;;  %v289_v20 = vld [vmem:[%s938_s28 + $0x50] sm:$0xff]  ;;  %v290_v21 = vld [vmem:[%s938_s28 + $0x58] sm:$0xff] }
  0xe6   : > { %694 = vrsqrt.f32 %v1040_v5  ;;  %v1068_v19 = vadd.f32 1.0, %v287_v15  ;;  %vm343_vm3 = vweird.f32 %v1040_v5  ;;  %vm353_vm4 = vweird.f32 %v1042_v6 }
  0xe7   : > { %696 = vrsqrt.f32 %v1042_v6  ;;  %vm363_vm5 = vweird.f32 %v1047_v10  ;;  %vm311_vm6 = vcmp.eq.f32.partialorder %v1038_v4, 0.0  ;;  %vm373_vm7 = vweird.f32 %v1050_v11 }
  0xe8   : > { %698 = vrsqrt.f32 %v1047_v10  ;;  %v1085_v25 = vadd.f32 1.0, %v288_v18  ;;  %v1094_v28 = vadd.f32 1.0, %v289_v20  ;;  %v1096_v29 = vadd.f32 1.0, %v290_v21 }
  0xe9   : > { %700 = vrsqrt.f32 %v1050_v11  ;;  %vm317_vm13 = vcmp.eq.f32.partialorder %v1061_v16, 0.0  ;;  %vm403_vm9 = vweird.f32 %v1063_v17 }
  0xea   : > { %702 = vrsqrt.f32 %v1053_v12 }
  0xeb   : > { %v1072_v22 = vpop.eup %692  ;;  %704 = vrsqrt.f32 %v1061_v16 }
  0xec   : > { %v1078_v23 = vpop.eup %694  ;;  %v328_v24 = vmul.f32 %v1072_v22, %v1038_v4  ;;  %706 = vrsqrt.f32 %v1063_v17  ;;  %vm334_vm8 = vweird.f32 %v1072_v22 }
  0xed   : > { %v1087_v26 = vpop.eup %696  ;;  %v338_v27 = vmul.f32 %v1078_v23, %v1040_v5  ;;  %vm344_vm11 = vweird.f32 %v1078_v23  ;;  %708 = vrsqrt.f32 %v1068_v19  ;;  %vm1139_vm15 = vmor %vm333_vm2, %vm334_vm8 }
  0xee   : > { %v1098_v30 = vpop.eup %698  ;;  %v329_v31 = vmul.f32 %v1072_v22, %v328_v24  ;;  %v348_v32 = vmul.f32 %v1087_v26, %v1042_v6  ;;  %vm354_vm14 = vweird.f32 %v1087_v26  ;;  %vm1153_vm2 = vmor %vm343_vm3, %vm344_vm11  ;;  %710 = vrsqrt.f32 %v1085_v25 }
  0xef   : > { %v1107_v33 = vpop.eup %700  ;;  %v339_v34 = vmul.f32 %v1078_v23, %v338_v27  ;;  %v358_v35 = vmul.f32 %v1098_v30, %v1047_v10  ;;  %vm364_vm0 = vweird.f32 %v1098_v30  ;;  %vm1163_vm8 = vmor %vm353_vm4, %vm354_vm14  ;;  %vm1433_vm14 = vweird.f32 %v1061_v16 }
  0xf0   : > { %v1115_v36 = vpop.eup %702  ;;  %v330_v37 = vmul.f32 0.5, %v329_v31  ;;  %v349_v38 = vmul.f32 %v1087_v26, %v348_v32  ;;  %v368_v39 = vmul.f32 %v1107_v33, %v1050_v11  ;;  %vm374_vm12 = vweird.f32 %v1107_v33  ;;  %vm1177_vm3 = vmor %vm363_vm5, %vm364_vm0 }
  0xf1   : > { %v1122_v40 = vpop.eup %704  ;;  %v340_v41 = vmul.f32 0.5, %v339_v34  ;;  %v359_v42 = vmul.f32 %v1098_v30, %v358_v35  ;;  %v378_v43 = vmul.f32 %v1115_v36, %v1053_v12  ;;  %vm1191_vm4 = vmor %vm373_vm7, %vm374_vm12  ;;  %vm1427_vm5 = vcmp.eq.f32.partialorder %v1040_v5, 0.0 }
  0xf2   : > { %v1129_v44 = vpop.eup %706  ;;  %v331_v45 = vsub.f32 1.5, %v330_v37  ;;  %v350_v46 = vmul.f32 0.5, %v349_v38  ;;  %v369_v47 = vmul.f32 %v1107_v33, %v368_v39  ;;  %v388_v48 = vmul.f32 %v1122_v40, %v1061_v16  ;;  %v291_v39 = vld [vmem:[%s938_s28 + $0x60] sm:$0xff] }
  0xf3   : > { %v341_v50 = vsub.f32 1.5, %v340_v41  ;;  %v360_v51 = vmul.f32 0.5, %v359_v42  ;;  %v379_v52 = vmul.f32 %v1115_v36, %v378_v43  ;;  %vm394_vm10 = vweird.f32 %v1122_v40  ;;  %v1146_v53 = vpop.eup %708  ;;  %v292_v41 = vld [vmem:[%s938_s28 + $0x68] sm:$0xff] }
  0xf4   : > { %v332_v54 = vmul.f32 %v1072_v22, %v331_v45  ;;  %v351_v56 = vsub.f32 1.5, %v350_v46  ;;  %v370_v57 = vmul.f32 0.5, %v369_v47  ;;  %v389_v58 = vmul.f32 %v1122_v40, %v388_v48  ;;  %v294_v45 = vld [vmem:[%s938_s28 + $0x78] sm:$0xff]  ;;  %v711_v47 = vpop.eup %710 }
  0xf5   : > { %v342_v59 = vmul.f32 %v1078_v23, %v341_v50  ;;  %v361_v61 = vsub.f32 1.5, %v360_v51  ;;  %v380_v62 = vmul.f32 0.5, %v379_v52  ;;  %v398_v63 = vmul.f32 %v1129_v44, %v1063_v17 }
  0xf6   : > { %v336_v0 = vsel %vm1139_vm15, %v1072_v22, %v332_v54  ;;  %v352_v1 = vmul.f32 %v1087_v26, %v351_v56  ;;  %v371_v3 = vsub.f32 1.5, %v370_v57  ;;  %v390_v7 = vmul.f32 0.5, %v389_v58  ;;  %vm1223_vm15 = vmor %vm1433_vm14, %vm394_vm10 }
  0xf7   : > { %v487_v8 = vsel %vm311_vm6, 0.0, %v336_v0  ;;  %v346_v9 = vsel %vm1153_vm2, %v1078_v23, %v342_v59  ;;  %v362_v13 = vmul.f32 %v1098_v30, %v361_v61  ;;  %v381_v15 = vsub.f32 1.5, %v380_v62 }
  0xf8   : > { %503 = vst.msk [vmem:[%s938_s28] sm:$0xff] %vm258_vm1, %v487_v8  ;;  %v488_v4 = vsel %vm1427_vm5, 0.0, %v346_v9  ;;  %v356_v18 = vsel %vm1163_vm8, %v1087_v26, %v352_v1  ;;  %v372_v20 = vmul.f32 %v1107_v33, %v371_v3  ;;  %vm1428_vm6 = vweird.f32 %v1115_v36 }
  0xf9   : > { %vm1429_vm7 = vweird.f32 %v1053_v12  ;;  %v391_v22 = vsub.f32 1.5, %v390_v7  ;;  %504 = vst.msk [vmem:[%s938_s28 + $0x8] sm:$0xff] %vm258_vm1, %v488_v4  ;;  %vm1432_vm12 = vcmp.eq.f32.partialorder %v1042_v6, 0.0  ;;  %v366_v23 = vsel %vm1177_vm3, %v1098_v30, %v362_v13 }
  0xfa   : > { %vm1207_vm11 = vmor %vm1429_vm7, %vm1428_vm6  ;;  %v489_v5 = vsel %vm1432_vm12, 0.0, %v356_v18  ;;  %v382_v24 = vmul.f32 %v1115_v36, %v381_v15  ;;  %v399_v27 = vmul.f32 %v1129_v44, %v398_v63  ;;  %vm1436_vm0 = vcmp.eq.f32.partialorder %v1047_v10, 0.0 }
  0xfb   : > { %505 = vst.msk [vmem:[%s938_s28 + $0x10] sm:$0xff] %vm258_vm1, %v489_v5  ;;  %v490_v6 = vsel %vm1436_vm0, 0.0, %v366_v23  ;;  %v376_v30 = vsel %vm1191_vm4, %v1107_v33, %v372_v20  ;;  %v392_v31 = vmul.f32 %v1122_v40, %v391_v22  ;;  %vm404_vm10 = vweird.f32 %v1129_v44 }
  0xfc   : > { %506 = vst.msk [vmem:[%s938_s28 + $0x18] sm:$0xff] %vm258_vm1, %v490_v6  ;;  %vm1437_vm2 = vcmp.eq.f32.partialorder %v1050_v11, 0.0  ;;  %v386_v10 = vsel %vm1207_vm11, %v1115_v36, %v382_v24  ;;  %v400_v34 = vmul.f32 0.5, %v399_v27  ;;  %v408_v33 = vmul.f32 %v1146_v53, %v1068_v19  ;;  %vm405_vm4 = vmor %vm403_vm9, %vm404_vm10 }
  0xfd   : > { %v491_v32 = vsel %vm1437_vm2, 0.0, %v376_v30  ;;  %vm1438_vm8 = vcmp.eq.f32.partialorder %v1053_v12, 0.0  ;;  %v396_v37 = vsel %vm1223_vm15, %v1122_v40, %v392_v31  ;;  %vm318_vm3 = vcmp.eq.f32.partialorder %v1063_v17, 0.0  ;;  %v293_v40 = vld [vmem:[%s938_s28 + $0x70] sm:$0xff] }
  0xfe   : > { %507 = vst.msk [vmem:[%s938_s28 + $0x20] sm:$0xff] %vm258_vm1, %v491_v32  ;;  %v492_v35 = vsel %vm1438_vm8, 0.0, %v386_v10  ;;  %v493_v11 = vsel %vm317_vm13, 0.0, %v396_v37  ;;  %v401_v36 = vsub.f32 1.5, %v400_v34  ;;  %v409_v38 = vmul.f32 %v1146_v53, %v408_v33 }
  0xff   : > { %508 = vst.msk [vmem:[%s938_s28 + $0x28] sm:$0xff] %vm258_vm1, %v492_v35  ;;  %vm413_vm5 = vweird.f32 %v1068_v19  ;;  %712 = vrsqrt.f32 %v1094_v28  ;;  %vm414_vm13 = vweird.f32 %v1146_v53  ;;  %v1274_v42 = vadd.f32 1.0, %v291_v39 }
 0x100   : > { %509 = vst.msk [vmem:[%s938_s28 + $0x30] sm:$0xff] %vm258_vm1, %v493_v11  ;;  %v402_v12 = vmul.f32 %v1129_v44, %v401_v36  ;;  %v410_v16 = vmul.f32 0.5, %v409_v38  ;;  %714 = vrsqrt.f32 %v1096_v29  ;;  %v1276_v43 = vadd.f32 1.0, %v292_v41  ;;  %vm1280_vm9 = vmor %vm413_vm5, %vm414_vm13 }
 0x101   : > { %716 = vrsqrt.f32 %v1274_v42  ;;  %v1285_v50 = vadd.f32 1.0, %v293_v40  ;;  %vm319_vm6 = vcmp.eq.f32.partialorder %v1068_v19, 0.0  ;;  %v1292_v52 = vadd.f32 1.0, %v294_v45 }
 0x102   : > { %v406_v17 = vsel %vm405_vm4, %v1129_v44, %v402_v12  ;;  %v411_v46 = vsub.f32 1.5, %v410_v16  ;;  %v418_v44 = vmul.f32 %v711_v47, %v1085_v25  ;;  %718 = vrsqrt.f32 %v1276_v43 }
 0x103   : > { %v494_v48 = vsel %vm318_vm3, 0.0, %v406_v17  ;;  %vm320_vm7 = vcmp.eq.f32.partialorder %v1085_v25, 0.0  ;;  %vm423_vm11 = vweird.f32 %v1085_v25  ;;  %720 = vrsqrt.f32 %v1285_v50 }
 0x104   : > { %510 = vst.msk [vmem:[%s938_s28 + $0x38] sm:$0xff] %vm258_vm1, %v494_v48  ;;  %v412_v51 = vmul.f32 %v1146_v53, %v411_v46  ;;  %v419_v57 = vmul.f32 %v711_v47, %v418_v44  ;;  %vm424_vm12 = vweird.f32 %v711_v47  ;;  %722 = vrsqrt.f32 %v1292_v52 }
 0x105   : > { %v713_v54 = vpop.eup %712  ;;  %vm321_vm14 = vcmp.eq.f32.partialorder %v1094_v28, 0.0  ;;  %vm433_vm15 = vweird.f32 %v1094_v28  ;;  %vm322_vm0 = vcmp.eq.f32.partialorder %v1096_v29, 0.0  ;;  %vm1312_vm2 = vmor %vm423_vm11, %vm424_vm12  ;;  %vm443_vm8 = vweird.f32 %v1096_v29 }
 0x106   : > { %v715_v55 = vpop.eup %714  ;;  %v416_v56 = vsel %vm1280_vm9, %v1146_v53, %v412_v51  ;;  %v428_v58 = vmul.f32 %v713_v54, %v1094_v28  ;;  %v420_v60 = vmul.f32 0.5, %v419_v57  ;;  %vm434_vm10 = vweird.f32 %v713_v54 }
 0x107   : > { %v495_v19 = vsel %vm319_vm6, 0.0, %v416_v56  ;;  %v438_v59 = vmul.f32 %v715_v55, %v1096_v29  ;;  %v717_v53 = vpop.eup %716  ;;  %vm444_vm3 = vweird.f32 %v715_v55  ;;  %vm323_vm4 = vcmp.eq.f32.partialorder %v1274_v42, 0.0  ;;  %vm1321_vm5 = vmor %vm433_vm15, %vm434_vm10 }
 0x108   : > { %511 = vst.msk [vmem:[%s938_s28 + $0x40] sm:$0xff] %vm258_vm1, %v495_v19  ;;  %v429_v61 = vmul.f32 %v713_v54, %v428_v58  ;;  %v421_v63 = vsub.f32 1.5, %v420_v60  ;;  %v448_v1 = vmul.f32 %v717_v53, %v1274_v42  ;;  %v719_v2 = vpop.eup %718  ;;  %vm453_vm13 = vweird.f32 %v1274_v42  ;;  %vm1332_vm11 = vmor %vm443_vm8, %vm444_vm3 }
 0x109   : > { %v439_v62 = vmul.f32 %v715_v55, %v438_v59  ;;  %v458_v14 = vmul.f32 %v719_v2, %v1276_v43  ;;  %v721_v15 = vpop.eup %720  ;;  %vm454_vm9 = vweird.f32 %v717_v53  ;;  %vm463_vm6 = vweird.f32 %v1276_v43 }
 0x10a   : > { %v430_v0 = vmul.f32 0.5, %v429_v61  ;;  %v422_v8 = vmul.f32 %v711_v47, %v421_v63  ;;  %v449_v13 = vmul.f32 %v717_v53, %v448_v1  ;;  %v723_v20 = vpop.eup %722  ;;  %vm464_vm12 = vweird.f32 %v719_v2 }
 0x10b   : > { %v440_v7 = vmul.f32 0.5, %v439_v62  ;;  %v459_v24 = vmul.f32 %v719_v2, %v458_v14  ;;  %v468_v6 = vmul.f32 %v721_v15, %v1285_v50  ;;  %v478_v10 = vmul.f32 %v723_v20, %v1292_v52 }
 0x10c   : > { %v431_v9 = vsub.f32 1.5, %v430_v0  ;;  %v426_v21 = vsel %vm1312_vm2, %v711_v47, %v422_v8  ;;  %v450_v23 = vmul.f32 0.5, %v449_v13  ;;  %vm324_vm15 = vcmp.eq.f32.partialorder %v1276_v43, 0.0 }
 0x10d   : > { %v441_v18 = vsub.f32 1.5, %v440_v7  ;;  %v496_v26 = vsel %vm320_vm7, 0.0, %v426_v21  ;;  %v460_v32 = vmul.f32 0.5, %v459_v24  ;;  %vm1351_vm7 = vmor %vm453_vm13, %vm454_vm9  ;;  %v469_v35 = vmul.f32 %v721_v15, %v468_v6 }
 0x10e   : > { %v432_v22 = vmul.f32 %v713_v54, %v431_v9  ;;  %512 = vst.msk [vmem:[%s938_s28 + $0x48] sm:$0xff] %vm258_vm1, %v496_v26  ;;  %v451_v31 = vsub.f32 1.5, %v450_v23  ;;  %v479_v36 = vmul.f32 %v723_v20, %v478_v10  ;;  %vm473_vm10 = vweird.f32 %v1285_v50 }
 0x10f   : > { %v442_v27 = vmul.f32 %v715_v55, %v441_v18  ;;  %v461_v11 = vsub.f32 1.5, %v460_v32  ;;  %v470_v39 = vmul.f32 0.5, %v469_v35  ;;  %vm474_vm2 = vweird.f32 %v721_v15 }
 0x110   : > { %v436_v30 = vsel %vm1321_vm5, %v713_v54, %v432_v22  ;;  %v452_v28 = vmul.f32 %v717_v53, %v451_v31  ;;  %v480_v12 = vmul.f32 0.5, %v479_v36  ;;  %vm484_vm8 = vweird.f32 %v723_v20  ;;  %vm475_vm3 = vmor %vm473_vm10, %vm474_vm2 }
 0x111   : > { %v497_v34 = vsel %vm321_vm14, 0.0, %v436_v30  ;;  %v446_v25 = vsel %vm1332_vm11, %v715_v55, %v442_v27  ;;  %vm1365_vm14 = vmor %vm463_vm6, %vm464_vm12  ;;  %v462_v41 = vmul.f32 %v719_v2, %v461_v11  ;;  %v471_v40 = vsub.f32 1.5, %v470_v39 }
 0x112   : > { %513 = vst.msk [vmem:[%s938_s28 + $0x50] sm:$0xff] %vm258_vm1, %v497_v34  ;;  %v498_v37 = vsel %vm322_vm0, 0.0, %v446_v25  ;;  %vm483_vm0 = vweird.f32 %v1292_v52  ;;  %v456_v29 = vsel %vm1351_vm7, %v717_v53, %v452_v28  ;;  %v481_v17 = vsub.f32 1.5, %v480_v12 }
 0x113   : > { %514 = vst.msk [vmem:[%s938_s28 + $0x58] sm:$0xff] %vm258_vm1, %v498_v37  ;;  %v499_v16 = vsel %vm323_vm4, 0.0, %v456_v29  ;;  %v466_v45 = vsel %vm1365_vm14, %v719_v2, %v462_v41  ;;  %vm325_vm5 = vcmp.eq.f32.partialorder %v1285_v50, 0.0  ;;  %v472_v47 = vmul.f32 %v721_v15, %v471_v40  ;;  %vm485_vm13 = vmor %vm483_vm0, %vm484_vm8 }
 0x114   : > { %515 = vst.msk [vmem:[%s938_s28 + $0x60] sm:$0xff] %vm258_vm1, %v499_v16  ;;  %v500_v46 = vsel %vm324_vm15, 0.0, %v466_v45  ;;  %vm326_vm4 = vcmp.eq.f32.partialorder %v1292_v52, 0.0  ;;  %v482_v42 = vmul.f32 %v723_v20, %v481_v17 }
 0x115   : > { %516 = vst.msk [vmem:[%s938_s28 + $0x68] sm:$0xff] %vm258_vm1, %v500_v46  ;;  %v476_v48 = vsel %vm475_vm3, %v721_v15, %v472_v47 }
 0x116   : > { %v501_v49 = vsel %vm325_vm5, 0.0, %v476_v48  ;;  %v486_v51 = vsel %vm485_vm13, %v723_v20, %v482_v42 }
 0x117   : > { %517 = vst.msk [vmem:[%s938_s28 + $0x70] sm:$0xff] %vm258_vm1, %v501_v49  ;;  %v502_v44 = vsel %vm326_vm4, 0.0, %v486_v51 }
 0x118   : > { %518 = vst.msk [vmem:[%s938_s28 + $0x78] sm:$0xff] %vm258_vm1, %v502_v44 }
 0x119 PF: > { %s14_s13 = sadd.s32 1, %s820_s13   ;;  %s1451_s6 = smov %s796_s7 }
 0x11a   : > { %p11_p3 = scmp.ge.s32.totalorder %s14_s13, 11   ;;  %s1452_s7 = smov %s800_s8 }
 0x11b   : > { %s1453_s8 = smov %s903_s26  ;;  %s1454_s9 = smov %s812_s11 }
 0x11c   : > { %s1455_s10 = smov %s816_s12  ;;  %s1456_s11 = smov %s1459_s15 }
 0x11d   : > { %s1457_s12 = smov %s1463_s16  ;;  %13 = sbr.rel (!%p11_p3) target bundleno = 5 (0x5), region = 72 }
 0x122   :  { %541 = vsyncpa [#allocation3], 1 }
 0x123   :  { %543 = vsyncpa [#allocation3 + $0x1], 1 }

</bundles_post_ra>
